<compile_context>
chip_gen: v5e
topology: v5e:2x2
jax: 0.10.0
libtpu: 0.0.40
codegen_flags: <defaults>
</compile_context>

<pallas_src>
import functools

import jax
import jax.numpy as jnp
from jax.experimental import pallas as pl
from jax.experimental.pallas import tpu as pltpu

C1 = 0.01 ** 2
C2 = 0.03 ** 2


def _ssim_kernel(x_ref, y_ref, o_ref, *, h, w):
    """x_ref / y_ref / o_ref: (B, h*w) -- each row is one flattened image plane."""
    hw = h * w

    x = x_ref[...].astype(jnp.float32)
    y = y_ref[...].astype(jnp.float32)

    # Per-pixel (row, col) position recovered from the lane index (computed
    # once per grid step; broadcasts over the B sublane rows).
    lane = jax.lax.broadcasted_iota(jnp.int32, (1, hw), 1)
    col = lane % w
    top = lane < w                  # row 0
    bot = lane >= (h - 1) * w       # row h-1
    lft = col == 0                  # col 0
    rgt = col == w - 1              # col w-1

    def pool9(a):
        # 9 * AvgPool2d(3, stride=1) over a ReflectionPad2d(1)-padded plane,
        # expressed as lane rotations (XLU) + boundary selects (VPU) on the
        # flattened lane-dense layout.  Separable: rows first, then columns.
        above = pltpu.roll(a, shift=w, axis=1)         # value from row r-1
        below = pltpu.roll(a, shift=hw - w, axis=1)    # value from row r+1
        v = jnp.where(top, below, above) + a + jnp.where(bot, above, below)
        left = pltpu.roll(v, shift=1, axis=1)          # value from col c-1
        right = pltpu.roll(v, shift=hw - 1, axis=1)    # value from col c+1
        return jnp.where(lft, right, left) + v + jnp.where(rgt, left, right)

    sx = pool9(x)
    sy = pool9(y)
    sxx = pool9(x * x)
    syy = pool9(y * y)
    sxy = pool9(x * y)

    # Work with the 9x-scaled pooled sums: mu = s/9, sigma = (9*s2 - s^2)/81.
    # The 1/81 factors of numerator and denominator cancel, so fold them into
    # C1/C2 instead of spending five extra multiplies per element.
    c1 = 81.0 * C1
    c2 = 81.0 * C2
    sx2 = sx * sx
    sy2 = sy * sy
    sxsy = sx * sy
    num = (2.0 * sxsy + c1) * (2.0 * (9.0 * sxy - sxsy) + c2)
    den = (sx2 + sy2 + c1) * ((9.0 * sxx - sx2) + (9.0 * syy - sy2) + c2)

    # den >= (81*C1)*(81*C2) > 0: the EUP approximate reciprocal is safe; one
    # Newton step restores ~f32 accuracy while keeping the divide off the VPU.
    r = pl.reciprocal(den, approx=True)
    r = r * (2.0 - den * r)
    res = (1.0 - num * r) * 0.5
    o_ref[...] = jnp.clip(res, 0.0, 1.0).astype(o_ref.dtype)


def _choose_planes_per_block(num_planes, hw):
    """Planes per grid step.  Must divide num_planes exactly (no pad/crop)."""
    plane_f32 = hw * 4
    # ~16 concurrently-live block-sized f32 buffers (x, y, five pooled sums,
    # pool/SSIM temporaries, double-buffered pipeline blocks).  40 MiB budget
    # stays below the 48 MiB scoped limit and v7x's 64 MiB physical VMEM.
    max_block_f32 = (40 << 20) // 16
    divisors = [d for d in range(1, num_planes + 1) if num_planes % d == 0]
    feasible = [d for d in divisors if d * plane_f32 <= max_block_f32] or [1]
    # TODO(synk): planes too large for VMEM would need halo-blocking along H.

    def rank(d):
        steps = num_planes // d
        return (
            d % 8 == 0 or d == num_planes,  # sublane-dense vregs / full extent
            min(steps, 4),                  # up to 4 grid steps (v7x pipelining)
            d,                              # then the largest block
        )

    return max(feasible, key=rank)


@jax.jit
def ssim_loss(x, y):
    """SSIM loss map matching the PyTorch `SSIM` module.  x, y: (N, C, H, W)."""
    assert x.shape == y.shape and x.ndim == 4
    N, C, H, W = x.shape
    assert H >= 2 and W >= 2, "ReflectionPad2d(1) needs H, W >= 2"

    P = N * C
    HW = H * W
    B = _choose_planes_per_block(P, HW)
    G = P // B

    # Contiguous (free) reshapes only -- no astype / pad / crop HBM passes.
    xv = x.reshape(G, B, HW)
    yv = y.reshape(G, B, HW)

    spec = pl.BlockSpec((None, B, HW), lambda i: (i, 0, 0))
    out = pl.pallas_call(
        functools.partial(_ssim_kernel, h=H, w=W),
        out_shape=jax.ShapeDtypeStruct((G, B, HW), x.dtype),
        grid=(G,),
        in_specs=[spec, spec],
        out_specs=spec,
        compiler_params=pltpu.CompilerParams(
            dimension_semantics=("parallel",),
            # Conservative limit that also fits v7x's 64 MiB VMEM/TC.
            vmem_limit_bytes=48 * 1024 * 1024,
        ),
    )(xv, yv)
    return out.reshape(N, C, H, W)


def _ssim_reference(x, y):
    """Pure-JAX/XLA reference identical to the PyTorch module (for checking)."""
    x = x.astype(jnp.float32)
    y = y.astype(jnp.float32)
    H, W = x.shape[2], x.shape[3]
    pad = ((0, 0), (0, 0), (1, 1), (1, 1))
    xp = jnp.pad(x, pad, mode="reflect")
    yp = jnp.pad(y, pad, mode="reflect")

    def pool(a):
        s = jnp.zeros_like(x)
        for di in range(3):
            for dj in range(3):
                s = s + a[:, :, di:di + H, dj:dj + W]
        return s / 9.0

    mu_x, mu_y = pool(xp), pool(yp)
    sigma_x = pool(xp * xp) - mu_x ** 2
    sigma_y = pool(yp * yp) - mu_y ** 2
    sigma_xy = pool(xp * yp) - mu_x * mu_y
    n = (2 * mu_x * mu_y + C1) * (2 * sigma_xy + C2)
    d = (mu_x ** 2 + mu_y ** 2 + C1) * (sigma_x + sigma_y + C2)
    return jnp.clip((1 - n / d) / 2, 0.0, 1.0)


if __name__ == "__main__":
    key = jax.random.PRNGKey(0)
    kx, ky = jax.random.split(key)
    N, C, H, W = 2, 4, 16, 16
    x = jax.random.uniform(kx, (N, C, H, W), dtype=jnp.float32)
    y = jax.random.uniform(ky, (N, C, H, W), dtype=jnp.float32)

    out = ssim_loss(x, y)
    jax.block_until_ready(out)

    assert out.shape == (N, C, H, W)
    assert out.dtype == x.dtype
    ref = _ssim_reference(x, y)
    err = float(jnp.max(jnp.abs(out.astype(jnp.float32) - ref)))
    assert err < 1e-3, f"mismatch vs reference: max abs err = {err}"
    assert bool(jnp.all(jnp.isfinite(out) & (out >= 0.0) & (out <= 1.0)))
    print("KERNEL_OK")
</pallas_src>

<mosaic_0001>
module attributes {stable_mosaic.version = 11 : i64} {
  func.func @_ssim_kernel(%arg0: i32, %arg1: memref<1x8x256xf32, #tpu.memory_space<vmem>>, %arg2: memref<1x8x256xf32, #tpu.memory_space<vmem>>, %arg3: memref<1x8x256xf32, #tpu.memory_space<vmem>>) attributes {dimension_semantics = [#tpu.dimension_semantics<parallel>], iteration_bounds = array<i64: 1>, scalar_prefetch = 0 : i64, scratch_operands = 0 : i64, tpu.core_type = #tpu.core_type<tc>, window_params = [{transform_indices = @transform_0, window_bounds = array<i64: 1, 8, 256>}, {transform_indices = @transform_1, window_bounds = array<i64: 1, 8, 256>}, {transform_indices = @transform_2, window_bounds = array<i64: 1, 8, 256>}]} {
    %c0 = arith.constant 0 : index
    %c0_0 = arith.constant 0 : index
    %c0_1 = arith.constant 0 : index
    %0 = vector.load %arg1[%c0, %c0_0, %c0_1] : memref<1x8x256xf32, #tpu.memory_space<vmem>>, vector<1x8x256xf32>
    %1 = vector.shape_cast %0 : vector<1x8x256xf32> to vector<8x256xf32>
    %c0_2 = arith.constant 0 : index
    %c0_3 = arith.constant 0 : index
    %c0_4 = arith.constant 0 : index
    %2 = vector.load %arg2[%c0_2, %c0_3, %c0_4] : memref<1x8x256xf32, #tpu.memory_space<vmem>>, vector<1x8x256xf32>
    %3 = vector.shape_cast %2 : vector<1x8x256xf32> to vector<8x256xf32>
    %4 = tpu.iota {dimensions = array<i32: 1>} : vector<1x256xi32>
    %c16_i32 = arith.constant 16 : i32
    %c0_i32 = arith.constant 0 : i32
    %5 = arith.cmpi eq, %c16_i32, %c0_i32 : i32
    %c1_i32 = arith.constant 1 : i32
    %6 = arith.select %5, %c1_i32, %c16_i32 : i32
    %7 = vector.broadcast %6 : i32 to vector<1x256xi32>
    %8 = arith.remsi %4, %7 : vector<1x256xi32>
    %c0_i32_5 = arith.constant 0 : i32
    %9 = vector.broadcast %c0_i32_5 : i32 to vector<1x256xi32>
    %10 = arith.cmpi ne, %8, %9 : vector<1x256xi32>
    %c0_i32_6 = arith.constant 0 : i32
    %11 = vector.broadcast %c0_i32_6 : i32 to vector<1x256xi32>
    %12 = arith.cmpi slt, %8, %11 : vector<1x256xi32>
    %c0_i32_7 = arith.constant 0 : i32
    %13 = arith.cmpi slt, %6, %c0_i32_7 : i32
    %14 = vector.broadcast %13 : i1 to vector<1x256xi1>
    %15 = vector.broadcast %14 : vector<1x256xi1> to vector<1x256xi1>
    %16 = arith.xori %12, %15 : vector<1x256xi1>
    %17 = arith.andi %16, %10 : vector<1x256xi1>
    %18 = vector.broadcast %6 : i32 to vector<1x256xi32>
    %19 = arith.addi %8, %18 : vector<1x256xi32>
    %20 = arith.select %17, %19, %8 : vector<1x256xi1>, vector<1x256xi32>
    %c16_i32_8 = arith.constant 16 : i32
    %21 = vector.broadcast %c16_i32_8 : i32 to vector<1x256xi32>
    %22 = arith.cmpi slt, %4, %21 : vector<1x256xi32>
    %c240_i32 = arith.constant 240 : i32
    %23 = vector.broadcast %c240_i32 : i32 to vector<1x256xi32>
    %24 = arith.cmpi sge, %4, %23 : vector<1x256xi32>
    %c0_i32_9 = arith.constant 0 : i32
    %25 = vector.broadcast %c0_i32_9 : i32 to vector<1x256xi32>
    %26 = arith.cmpi eq, %20, %25 : vector<1x256xi32>
    %c15_i32 = arith.constant 15 : i32
    %27 = vector.broadcast %c15_i32 : i32 to vector<1x256xi32>
    %28 = arith.cmpi eq, %20, %27 : vector<1x256xi32>
    %c16_i32_10 = arith.constant 16 : i32
    %29 = tpu.dynamic_rotate %1 by %c16_i32_10 dim 1 : vector<8x256xf32>, i32 -> vector<8x256xf32>
    %c240_i32_11 = arith.constant 240 : i32
    %30 = tpu.dynamic_rotate %1 by %c240_i32_11 dim 1 : vector<8x256xf32>, i32 -> vector<8x256xf32>
    %31 = vector.shape_cast %22 : vector<1x256xi1> to vector<1x256xi1>
    %32 = vector.broadcast %31 : vector<1x256xi1> to vector<8x256xi1>
    %33 = arith.select %32, %30, %29 : vector<8x256xi1>, vector<8x256xf32>
    %34 = arith.addf %33, %1 : vector<8x256xf32>
    %35 = vector.shape_cast %24 : vector<1x256xi1> to vector<1x256xi1>
    %36 = vector.broadcast %35 : vector<1x256xi1> to vector<8x256xi1>
    %37 = arith.select %36, %29, %30 : vector<8x256xi1>, vector<8x256xf32>
    %38 = arith.addf %34, %37 : vector<8x256xf32>
    %c1_i32_12 = arith.constant 1 : i32
    %39 = tpu.dynamic_rotate %38 by %c1_i32_12 dim 1 : vector<8x256xf32>, i32 -> vector<8x256xf32>
    %c255_i32 = arith.constant 255 : i32
    %40 = tpu.dynamic_rotate %38 by %c255_i32 dim 1 : vector<8x256xf32>, i32 -> vector<8x256xf32>
    %41 = vector.shape_cast %26 : vector<1x256xi1> to vector<1x256xi1>
    %42 = vector.broadcast %41 : vector<1x256xi1> to vector<8x256xi1>
    %43 = arith.select %42, %40, %39 : vector<8x256xi1>, vector<8x256xf32>
    %44 = arith.addf %43, %38 : vector<8x256xf32>
    %45 = vector.shape_cast %28 : vector<1x256xi1> to vector<1x256xi1>
    %46 = vector.broadcast %45 : vector<1x256xi1> to vector<8x256xi1>
    %47 = arith.select %46, %39, %40 : vector<8x256xi1>, vector<8x256xf32>
    %48 = arith.addf %44, %47 : vector<8x256xf32>
    %c16_i32_13 = arith.constant 16 : i32
    %49 = tpu.dynamic_rotate %3 by %c16_i32_13 dim 1 : vector<8x256xf32>, i32 -> vector<8x256xf32>
    %c240_i32_14 = arith.constant 240 : i32
    %50 = tpu.dynamic_rotate %3 by %c240_i32_14 dim 1 : vector<8x256xf32>, i32 -> vector<8x256xf32>
    %51 = vector.shape_cast %22 : vector<1x256xi1> to vector<1x256xi1>
    %52 = vector.broadcast %51 : vector<1x256xi1> to vector<8x256xi1>
    %53 = arith.select %52, %50, %49 : vector<8x256xi1>, vector<8x256xf32>
    %54 = arith.addf %53, %3 : vector<8x256xf32>
    %55 = vector.shape_cast %24 : vector<1x256xi1> to vector<1x256xi1>
    %56 = vector.broadcast %55 : vector<1x256xi1> to vector<8x256xi1>
    %57 = arith.select %56, %49, %50 : vector<8x256xi1>, vector<8x256xf32>
    %58 = arith.addf %54, %57 : vector<8x256xf32>
    %c1_i32_15 = arith.constant 1 : i32
    %59 = tpu.dynamic_rotate %58 by %c1_i32_15 dim 1 : vector<8x256xf32>, i32 -> vector<8x256xf32>
    %c255_i32_16 = arith.constant 255 : i32
    %60 = tpu.dynamic_rotate %58 by %c255_i32_16 dim 1 : vector<8x256xf32>, i32 -> vector<8x256xf32>
    %61 = vector.shape_cast %26 : vector<1x256xi1> to vector<1x256xi1>
    %62 = vector.broadcast %61 : vector<1x256xi1> to vector<8x256xi1>
    %63 = arith.select %62, %60, %59 : vector<8x256xi1>, vector<8x256xf32>
    %64 = arith.addf %63, %58 : vector<8x256xf32>
    %65 = vector.shape_cast %28 : vector<1x256xi1> to vector<1x256xi1>
    %66 = vector.broadcast %65 : vector<1x256xi1> to vector<8x256xi1>
    %67 = arith.select %66, %59, %60 : vector<8x256xi1>, vector<8x256xf32>
    %68 = arith.addf %64, %67 : vector<8x256xf32>
    %69 = arith.mulf %1, %1 : vector<8x256xf32>
    %c16_i32_17 = arith.constant 16 : i32
    %70 = tpu.dynamic_rotate %69 by %c16_i32_17 dim 1 : vector<8x256xf32>, i32 -> vector<8x256xf32>
    %c240_i32_18 = arith.constant 240 : i32
    %71 = tpu.dynamic_rotate %69 by %c240_i32_18 dim 1 : vector<8x256xf32>, i32 -> vector<8x256xf32>
    %72 = vector.shape_cast %22 : vector<1x256xi1> to vector<1x256xi1>
    %73 = vector.broadcast %72 : vector<1x256xi1> to vector<8x256xi1>
    %74 = arith.select %73, %71, %70 : vector<8x256xi1>, vector<8x256xf32>
    %75 = arith.addf %74, %69 : vector<8x256xf32>
    %76 = vector.shape_cast %24 : vector<1x256xi1> to vector<1x256xi1>
    %77 = vector.broadcast %76 : vector<1x256xi1> to vector<8x256xi1>
    %78 = arith.select %77, %70, %71 : vector<8x256xi1>, vector<8x256xf32>
    %79 = arith.addf %75, %78 : vector<8x256xf32>
    %c1_i32_19 = arith.constant 1 : i32
    %80 = tpu.dynamic_rotate %79 by %c1_i32_19 dim 1 : vector<8x256xf32>, i32 -> vector<8x256xf32>
    %c255_i32_20 = arith.constant 255 : i32
    %81 = tpu.dynamic_rotate %79 by %c255_i32_20 dim 1 : vector<8x256xf32>, i32 -> vector<8x256xf32>
    %82 = vector.shape_cast %26 : vector<1x256xi1> to vector<1x256xi1>
    %83 = vector.broadcast %82 : vector<1x256xi1> to vector<8x256xi1>
    %84 = arith.select %83, %81, %80 : vector<8x256xi1>, vector<8x256xf32>
    %85 = arith.addf %84, %79 : vector<8x256xf32>
    %86 = vector.shape_cast %28 : vector<1x256xi1> to vector<1x256xi1>
    %87 = vector.broadcast %86 : vector<1x256xi1> to vector<8x256xi1>
    %88 = arith.select %87, %80, %81 : vector<8x256xi1>, vector<8x256xf32>
    %89 = arith.addf %85, %88 : vector<8x256xf32>
    %90 = arith.mulf %3, %3 : vector<8x256xf32>
    %c16_i32_21 = arith.constant 16 : i32
    %91 = tpu.dynamic_rotate %90 by %c16_i32_21 dim 1 : vector<8x256xf32>, i32 -> vector<8x256xf32>
    %c240_i32_22 = arith.constant 240 : i32
    %92 = tpu.dynamic_rotate %90 by %c240_i32_22 dim 1 : vector<8x256xf32>, i32 -> vector<8x256xf32>
    %93 = vector.shape_cast %22 : vector<1x256xi1> to vector<1x256xi1>
    %94 = vector.broadcast %93 : vector<1x256xi1> to vector<8x256xi1>
    %95 = arith.select %94, %92, %91 : vector<8x256xi1>, vector<8x256xf32>
    %96 = arith.addf %95, %90 : vector<8x256xf32>
    %97 = vector.shape_cast %24 : vector<1x256xi1> to vector<1x256xi1>
    %98 = vector.broadcast %97 : vector<1x256xi1> to vector<8x256xi1>
    %99 = arith.select %98, %91, %92 : vector<8x256xi1>, vector<8x256xf32>
    %100 = arith.addf %96, %99 : vector<8x256xf32>
    %c1_i32_23 = arith.constant 1 : i32
    %101 = tpu.dynamic_rotate %100 by %c1_i32_23 dim 1 : vector<8x256xf32>, i32 -> vector<8x256xf32>
    %c255_i32_24 = arith.constant 255 : i32
    %102 = tpu.dynamic_rotate %100 by %c255_i32_24 dim 1 : vector<8x256xf32>, i32 -> vector<8x256xf32>
    %103 = vector.shape_cast %26 : vector<1x256xi1> to vector<1x256xi1>
    %104 = vector.broadcast %103 : vector<1x256xi1> to vector<8x256xi1>
    %105 = arith.select %104, %102, %101 : vector<8x256xi1>, vector<8x256xf32>
    %106 = arith.addf %105, %100 : vector<8x256xf32>
    %107 = vector.shape_cast %28 : vector<1x256xi1> to vector<1x256xi1>
    %108 = vector.broadcast %107 : vector<1x256xi1> to vector<8x256xi1>
    %109 = arith.select %108, %101, %102 : vector<8x256xi1>, vector<8x256xf32>
    %110 = arith.addf %106, %109 : vector<8x256xf32>
    %111 = arith.mulf %1, %3 : vector<8x256xf32>
    %c16_i32_25 = arith.constant 16 : i32
    %112 = tpu.dynamic_rotate %111 by %c16_i32_25 dim 1 : vector<8x256xf32>, i32 -> vector<8x256xf32>
    %c240_i32_26 = arith.constant 240 : i32
    %113 = tpu.dynamic_rotate %111 by %c240_i32_26 dim 1 : vector<8x256xf32>, i32 -> vector<8x256xf32>
    %114 = vector.shape_cast %22 : vector<1x256xi1> to vector<1x256xi1>
    %115 = vector.broadcast %114 : vector<1x256xi1> to vector<8x256xi1>
    %116 = arith.select %115, %113, %112 : vector<8x256xi1>, vector<8x256xf32>
    %117 = arith.addf %116, %111 : vector<8x256xf32>
    %118 = vector.shape_cast %24 : vector<1x256xi1> to vector<1x256xi1>
    %119 = vector.broadcast %118 : vector<1x256xi1> to vector<8x256xi1>
    %120 = arith.select %119, %112, %113 : vector<8x256xi1>, vector<8x256xf32>
    %121 = arith.addf %117, %120 : vector<8x256xf32>
    %c1_i32_27 = arith.constant 1 : i32
    %122 = tpu.dynamic_rotate %121 by %c1_i32_27 dim 1 : vector<8x256xf32>, i32 -> vector<8x256xf32>
    %c255_i32_28 = arith.constant 255 : i32
    %123 = tpu.dynamic_rotate %121 by %c255_i32_28 dim 1 : vector<8x256xf32>, i32 -> vector<8x256xf32>
    %124 = vector.shape_cast %26 : vector<1x256xi1> to vector<1x256xi1>
    %125 = vector.broadcast %124 : vector<1x256xi1> to vector<8x256xi1>
    %126 = arith.select %125, %123, %122 : vector<8x256xi1>, vector<8x256xf32>
    %127 = arith.addf %126, %121 : vector<8x256xf32>
    %128 = vector.shape_cast %28 : vector<1x256xi1> to vector<1x256xi1>
    %129 = vector.broadcast %128 : vector<1x256xi1> to vector<8x256xi1>
    %130 = arith.select %129, %122, %123 : vector<8x256xi1>, vector<8x256xf32>
    %131 = arith.addf %127, %130 : vector<8x256xf32>
    %132 = arith.mulf %48, %48 : vector<8x256xf32>
    %133 = arith.mulf %68, %68 : vector<8x256xf32>
    %134 = arith.mulf %48, %68 : vector<8x256xf32>
    %cst = arith.constant 2.000000e+00 : f32
    %135 = vector.broadcast %cst : f32 to vector<8x256xf32>
    %136 = arith.mulf %135, %134 : vector<8x256xf32>
    %cst_29 = arith.constant 8.100000e-03 : f32
    %137 = vector.broadcast %cst_29 : f32 to vector<8x256xf32>
    %138 = arith.addf %136, %137 : vector<8x256xf32>
    %cst_30 = arith.constant 9.000000e+00 : f32
    %139 = vector.broadcast %cst_30 : f32 to vector<8x256xf32>
    %140 = arith.mulf %139, %131 : vector<8x256xf32>
    %141 = arith.subf %140, %134 : vector<8x256xf32>
    %cst_31 = arith.constant 2.000000e+00 : f32
    %142 = vector.broadcast %cst_31 : f32 to vector<8x256xf32>
    %143 = arith.mulf %142, %141 : vector<8x256xf32>
    %cst_32 = arith.constant 7.290000e-02 : f32
    %144 = vector.broadcast %cst_32 : f32 to vector<8x256xf32>
    %145 = arith.addf %143, %144 : vector<8x256xf32>
    %146 = arith.mulf %138, %145 : vector<8x256xf32>
    %147 = arith.addf %132, %133 : vector<8x256xf32>
    %cst_33 = arith.constant 8.100000e-03 : f32
    %148 = vector.broadcast %cst_33 : f32 to vector<8x256xf32>
    %149 = arith.addf %147, %148 : vector<8x256xf32>
    %cst_34 = arith.constant 9.000000e+00 : f32
    %150 = vector.broadcast %cst_34 : f32 to vector<8x256xf32>
    %151 = arith.mulf %150, %89 : vector<8x256xf32>
    %152 = arith.subf %151, %132 : vector<8x256xf32>
    %cst_35 = arith.constant 9.000000e+00 : f32
    %153 = vector.broadcast %cst_35 : f32 to vector<8x256xf32>
    %154 = arith.mulf %153, %110 : vector<8x256xf32>
    %155 = arith.subf %154, %133 : vector<8x256xf32>
    %156 = arith.addf %152, %155 : vector<8x256xf32>
    %cst_36 = arith.constant 7.290000e-02 : f32
    %157 = vector.broadcast %cst_36 : f32 to vector<8x256xf32>
    %158 = arith.addf %156, %157 : vector<8x256xf32>
    %159 = arith.mulf %149, %158 : vector<8x256xf32>
    %160 = tpu.reciprocal %159 {approx = true} : vector<8x256xf32> -> vector<8x256xf32>
    %161 = arith.mulf %159, %160 : vector<8x256xf32>
    %cst_37 = arith.constant 2.000000e+00 : f32
    %162 = vector.broadcast %cst_37 : f32 to vector<8x256xf32>
    %163 = arith.subf %162, %161 : vector<8x256xf32>
    %164 = arith.mulf %160, %163 : vector<8x256xf32>
    %165 = arith.mulf %146, %164 : vector<8x256xf32>
    %cst_38 = arith.constant 1.000000e+00 : f32
    %166 = vector.broadcast %cst_38 : f32 to vector<8x256xf32>
    %167 = arith.subf %166, %165 : vector<8x256xf32>
    %cst_39 = arith.constant 5.000000e-01 : f32
    %168 = vector.broadcast %cst_39 : f32 to vector<8x256xf32>
    %169 = arith.mulf %167, %168 : vector<8x256xf32>
    %cst_40 = arith.constant 0.000000e+00 : f32
    %cst_41 = arith.constant 1.000000e+00 : f32
    %170 = vector.broadcast %cst_40 : f32 to vector<8x256xf32>
    %171 = arith.maximumf %170, %169 : vector<8x256xf32>
    %172 = vector.broadcast %cst_41 : f32 to vector<8x256xf32>
    %173 = arith.minimumf %172, %171 : vector<8x256xf32>
    %c0_42 = arith.constant 0 : index
    %c0_43 = arith.constant 0 : index
    %c0_44 = arith.constant 0 : index
    %174 = vector.load %arg3[%c0_42, %c0_43, %c0_44] : memref<1x8x256xf32, #tpu.memory_space<vmem>>, vector<1x8x256xf32>
    %175 = vector.shape_cast %174 : vector<1x8x256xf32> to vector<8x256xf32>
    %176 = vector.shape_cast %173 : vector<8x256xf32> to vector<1x8x256xf32>
    tpu.vector_store %arg3[%c0_42, %c0_43, %c0_44], %176 {strides = array<i32>} : memref<1x8x256xf32, #tpu.memory_space<vmem>>, vector<1x8x256xf32>,
    return
  }
  func.func @transform_0(%arg0: i32) -> (i32, i32, i32) {
    %c0_i32 = arith.constant 0 : i32
    %c0_i32_0 = arith.constant 0 : i32
    %c0_i32_1 = arith.constant 0 : i32
    return %arg0, %c0_i32, %c0_i32_0 : i32, i32, i32
  }
  func.func @transform_1(%arg0: i32) -> (i32, i32, i32) {
    %c0_i32 = arith.constant 0 : i32
    %c0_i32_0 = arith.constant 0 : i32
    %c0_i32_1 = arith.constant 0 : i32
    return %arg0, %c0_i32, %c0_i32_0 : i32, i32, i32
  }
  func.func @transform_2(%arg0: i32) -> (i32, i32, i32) {
    %c0_i32 = arith.constant 0 : i32
    %c0_i32_0 = arith.constant 0 : i32
    %c0_i32_1 = arith.constant 0 : i32
    return %arg0, %c0_i32, %c0_i32_0 : i32, i32, i32
  }
}

</mosaic_0001>

<bundles_post_ra>
// kernel: ssim_loss.1
= control target key start
LH: loop header
LB: loop body
LE: loop exit
PB: predicated region body
PF: predicated region fallthrough
CT: control target
= control target key end

     0   :  { %s345_s11 = smov 112   ;;  %s346_s12 = smov 16   ;;  %v15_v11 = vlaneseq  ;;  %s678_s0 = inlined_call_operand.vmem [shape: f32[1,8,256], index: 0, kind: input, shape index: {}]   ;;  %s679_s1 = inlined_call_operand.vmem [shape: f32[1,8,256], index: 1, kind: input, shape index: {}]   ;;  %s680_s2 = inlined_call_operand.vmem [shape: f32[1,8,256], index: 2, kind: output, shape index: {}]  }
   0x1   :  { %v11_v0 = vld [vmem:[%s678_s0] sm:$0xff]  ;;  %v12_v2 = vld [vmem:[%s678_s0 + $0x8] sm:$0xff]  ;;  %s347_s0 = smov 1  }
   0x2   :  { %56 = vrot.lane.b32.xlu1 %v11_v0, %s345_s11  ;;  %50 = vrot.lane.b32.xlu0 %v11_v0, %s346_s12  ;;  %v370_v1 = vld [vmem:[%s679_s1] sm:$0xff]  ;;  %v14_v3 = vld [vmem:[%s679_s1 + $0x8] sm:$0xff]  ;;  %v379_v4 = vmul.f32 %v11_v0, %v11_v0  ;;  %v383_v5 = vmul.f32 %v12_v2, %v12_v2  ;;  %v407_v12 = vand.u32 127, %v15_v11  ;;  %s348_s1 = smov 127  }
   0x3   :  { %109 = vrot.lane.b32.xlu2 %v370_v1, %s346_s12  ;;  %v390_v6 = vmul.f32 %v370_v1, %v370_v1  ;;  %v392_v7 = vmul.f32 %v14_v3, %v14_v3  ;;  %v398_v8 = vmul.f32 %v370_v1, %v11_v0  ;;  %v400_v9 = vmul.f32 %v14_v3, %v12_v2 }
   0x4   :  { %v410_v15 = vadd.s32 128, %v407_v12  ;;  %vm42_vm0 = vcmp.lt.s32.totalorder %v407_v12, 16  ;;  %vm60_vm1 = vcmp.lt.s32.totalorder %v407_v12, 112  ;;  %vm83_vm3 = vcmp.lt.s32.totalorder %v407_v12, 1 }
   0x5   :  { %vm90_vm4 = vcmp.lt.s32.totalorder %v407_v12, 127 }
   0x6   :  { %vm45_vm2 = vcmp.ge.s32.totalorder %v410_v15, 240 }
   0xa   :  { %58 = vrot.lane.b32.xlu1 %v12_v2, %s345_s11  ;;  %52 = vrot.lane.b32.xlu0 %v12_v2, %s346_s12 }
   0xb   :  { %111 = vrot.lane.b32.xlu2 %v14_v3, %s346_s12 }
  0x12   :  { %117 = vrot.lane.b32.xlu1 %v14_v3, %s345_s11  ;;  %115 = vrot.lane.b32.xlu0 %v370_v1, %s345_s11 }
  0x13   :  { %151 = vrot.lane.b32.xlu2 %v379_v4, %s346_s12 }
  0x1a   :  { %153 = vrot.lane.b32.xlu0 %v383_v5, %s346_s12  ;;  %157 = vrot.lane.b32.xlu1 %v379_v4, %s345_s11 }
  0x1b   :  { %159 = vrot.lane.b32.xlu2 %v383_v5, %s345_s11 }
  0x22   :  { %193 = vrot.lane.b32.xlu0 %v390_v6, %s346_s12  ;;  %195 = vrot.lane.b32.xlu1 %v392_v7, %s346_s12 }
  0x23   :  { %199 = vrot.lane.b32.xlu2 %v390_v6, %s345_s11 }
  0x2a   :  { %201 = vrot.lane.b32.xlu0 %v392_v7, %s345_s11  ;;  %235 = vrot.lane.b32.xlu1 %v398_v8, %s346_s12 }
  0x2b   :  { %237 = vrot.lane.b32.xlu2 %v400_v9, %s346_s12 }
  0x32   :  { %241 = vrot.lane.b32.xlu0 %v398_v8, %s345_s11  ;;  %243 = vrot.lane.b32.xlu1 %v400_v9, %s345_s11 }
  0x5d   :  { %v110_v10 = vpop.permute.xlu2 %109 }
  0x65   :  { %v112_v16 = vpop.permute.xlu2 %111 }
  0x66   :  { %v113_v27 = vsel %vm42_vm0, %v110_v10, %v112_v16  ;;  %v114_v37 = vsel %vm42_vm0, %v112_v16, %v110_v10 }
  0x67   :  { %v124_v32 = vadd.f32 %v113_v27, %v14_v3 }
  0x6d   :  { %v152_v28 = vpop.permute.xlu2 %151 }
  0x74   :  { %v57_v13 = vpop.permute.xlu1 %56  ;;  %v51_v14 = vpop.permute.xlu0 %50 }
  0x75   :  { %v160_v43 = vpop.permute.xlu2 %159 }
  0x7c   :  { %v59_v17 = vpop.permute.xlu1 %58  ;;  %v53_v18 = vpop.permute.xlu0 %52 }
  0x7d   :  { %v62_v19 = vsel %vm60_vm1, %v59_v17, %v57_v13  ;;  %v54_v20 = vsel %vm42_vm0, %v51_v14, %v53_v18  ;;  %v61_v21 = vsel %vm60_vm1, %v57_v13, %v59_v17  ;;  %v55_v22 = vsel %vm42_vm0, %v53_v18, %v51_v14  ;;  %v200_v55 = vpop.permute.xlu2 %199 }
  0x7e   :  { %v70_v23 = vadd.f32 %v54_v20, %v12_v2  ;;  %v76_v24 = vsel %vm45_vm2, %v54_v20, %v62_v19  ;;  %v67_v26 = vsel %vm42_vm0, %v61_v21, %v55_v22 }
  0x7f   :  { %v69_v29 = vadd.f32 %v67_v26, %v11_v0 }
  0x80   :  { %v425_v25 = vadd.f32 %v76_v24, %v70_v23 }
  0x81   :  { %v445_v38 = vadd.f32 %v69_v29, %v61_v21 }
  0x82   :  { %81 = vrot.lane.b32.xlu0 %v425_v25, %s347_s0  ;;  %88 = vrot.lane.b32.xlu2 %v425_v25, %s348_s1 }
  0x84   :  { %v118_v30 = vpop.permute.xlu1 %117  ;;  %v116_v31 = vpop.permute.xlu0 %115 }
  0x85   :  { %v120_v33 = vsel %vm60_vm1, %v118_v30, %v116_v31  ;;  %v119_v34 = vsel %vm60_vm1, %v116_v31, %v118_v30  ;;  %v22_v30 = vand.u32 15, %v407_v12 }
  0x86   :  { %v126_v35 = vsel %vm45_vm2, %v113_v27, %v120_v33  ;;  %v121_v39 = vsel %vm42_vm0, %v119_v34, %v114_v37  ;;  %v29_v33 = vand.u32 15, %v410_v15 }
  0x87   :  { %v441_v36 = vadd.f32 %v126_v35, %v124_v32  ;;  %v123_v40 = vadd.f32 %v121_v39, %v370_v1  ;;  %vm546_vm5 = vcmp.eq.s32.totalorder %v22_v30, 0  ;;  %vm572_vm7 = vcmp.eq.s32.totalorder %v22_v30, 15 }
  0x88   :  { %vm560_vm6 = vcmp.eq.s32.totalorder %v29_v33, 0  ;;  %vm586_vm8 = vcmp.eq.s32.totalorder %v29_v33, 15 }
  0x89   :  { %131 = vrot.lane.b32.xlu1 %v441_v36, %s347_s0  ;;  %v456_v44 = vadd.f32 %v123_v40, %v119_v34 }
  0x8a   :  { %137 = vrot.lane.b32.xlu0 %v441_v36, %s348_s1  ;;  %79 = vrot.lane.b32.xlu2 %v445_v38, %s347_s0 }
  0x8c   :  { %v154_v41 = vpop.permute.xlu0 %153  ;;  %v158_v42 = vpop.permute.xlu1 %157 }
  0x8d   :  { %v155_v45 = vsel %vm42_vm0, %v152_v28, %v154_v41  ;;  %v162_v46 = vsel %vm60_vm1, %v160_v43, %v158_v42  ;;  %v156_v51 = vsel %vm42_vm0, %v154_v41, %v152_v28  ;;  %v161_v52 = vsel %vm60_vm1, %v158_v42, %v160_v43 }
  0x8e   :  { %v166_v47 = vadd.f32 %v155_v45, %v383_v5  ;;  %v168_v48 = vsel %vm45_vm2, %v155_v45, %v162_v46  ;;  %v163_v54 = vsel %vm42_vm0, %v161_v52, %v156_v51 }
  0x8f   :  { %v165_v57 = vadd.f32 %v163_v54, %v379_v4 }
  0x90   :  { %v475_v53 = vadd.f32 %v168_v48, %v166_v47 }
  0x91   :  { %86 = vrot.lane.b32.xlu1 %v445_v38, %s348_s1  ;;  %v497_v2 = vadd.f32 %v165_v57, %v161_v52 }
  0x92   :  { %129 = vrot.lane.b32.xlu0 %v456_v44, %s347_s0  ;;  %135 = vrot.lane.b32.xlu2 %v456_v44, %s348_s1 }
  0x94   :  { %v194_v49 = vpop.permute.xlu0 %193  ;;  %v196_v50 = vpop.permute.xlu1 %195 }
  0x95   :  { %v197_v56 = vsel %vm42_vm0, %v194_v49, %v196_v50  ;;  %v198_v60 = vsel %vm42_vm0, %v196_v50, %v194_v49 }
  0x96   :  { %v208_v61 = vadd.f32 %v197_v56, %v392_v7  ;;  %v238_v7 = vpop.permute.xlu2 %237 }
  0x99   :  { %179 = vrot.lane.b32.xlu1 %v475_v53, %s348_s1 }
  0x9a   :  { %173 = vrot.lane.b32.xlu2 %v475_v53, %s347_s0 }
  0x9c   :  { %v202_v58 = vpop.permute.xlu0 %201  ;;  %v236_v59 = vpop.permute.xlu1 %235 }
  0x9d   :  { %v203_v62 = vsel %vm60_vm1, %v200_v55, %v202_v58  ;;  %v204_v63 = vsel %vm60_vm1, %v202_v58, %v200_v55  ;;  %v239_v14 = vsel %vm42_vm0, %v236_v59, %v238_v7 }
  0x9e   :  { %v205_v0 = vsel %vm42_vm0, %v203_v62, %v198_v60  ;;  %v210_v1 = vsel %vm45_vm2, %v197_v56, %v204_v63  ;;  %v250_v18 = vadd.f32 %v239_v14, %v400_v9 }
  0x9f   :  { %v207_v3 = vadd.f32 %v205_v0, %v390_v6  ;;  %v500_v4 = vadd.f32 %v210_v1, %v208_v61  ;;  %v240_v6 = vsel %vm42_vm0, %v238_v7, %v236_v59 }
  0xa1   :  { %v502_v5 = vadd.f32 %v207_v3, %v203_v62  ;;  %171 = vrot.lane.b32.xlu1 %v497_v2, %s347_s0  ;;  %215 = vrot.lane.b32.xlu0 %v500_v4, %s347_s0 }
  0xa3   :  { %213 = vrot.lane.b32.xlu2 %v502_v5, %s347_s0 }
  0xa4   :  { %v242_v10 = vpop.permute.xlu0 %241  ;;  %v244_v11 = vpop.permute.xlu1 %243 }
  0xa5   :  { %v245_v13 = vsel %vm60_vm1, %v242_v10, %v244_v11  ;;  %v246_v17 = vsel %vm60_vm1, %v244_v11, %v242_v10 }
  0xa6   :  { %v247_v16 = vsel %vm42_vm0, %v245_v13, %v240_v6  ;;  %v252_v20 = vsel %vm45_vm2, %v239_v14, %v246_v17 }
  0xa7   :  { %v249_v19 = vadd.f32 %v247_v16, %v398_v8  ;;  %v532_v22 = vadd.f32 %v252_v20, %v250_v18 }
  0xa9   :  { %177 = vrot.lane.b32.xlu0 %v497_v2, %s348_s1  ;;  %219 = vrot.lane.b32.xlu1 %v502_v5, %s348_s1  ;;  %v530_v21 = vadd.f32 %v249_v19, %v245_v13 }
  0xab   :  { %221 = vrot.lane.b32.xlu2 %v500_v4, %s348_s1 }
  0xb1   :  { %255 = vrot.lane.b32.xlu0 %v530_v21, %s347_s0  ;;  %257 = vrot.lane.b32.xlu1 %v532_v22, %s347_s0 }
  0xb3   :  { %261 = vrot.lane.b32.xlu2 %v530_v21, %s348_s1 }
  0xb9   :  { %263 = vrot.lane.b32.xlu0 %v532_v22, %s348_s1 }
  0xdc   :  { %v89_v8 = vpop.permute.xlu2 %88 }
  0xe4   :  { %v80_v9 = vpop.permute.xlu2 %79 }
  0xec   :  { %v136_v26 = vpop.permute.xlu2 %135 }
  0xf4   :  { %v82_v23 = vpop.permute.xlu0 %81  ;;  %v174_v29 = vpop.permute.xlu2 %173 }
  0xf5   :  { %v85_v39 = vsel %vm83_vm3, %v82_v23, %v80_v9  ;;  %v84_v47 = vsel %vm83_vm3, %v80_v9, %v82_v23 }
  0xfb   :  { %v132_v24 = vpop.permute.xlu1 %131 }
  0xfc   :  { %v138_v27 = vpop.permute.xlu0 %137 }
  0xfd   :  { %v139_v40 = vsel %vm90_vm4, %v136_v26, %v138_v27  ;;  %v214_v15 = vpop.permute.xlu2 %213  ;;  %v140_v50 = vsel %vm90_vm4, %v138_v27, %v136_v26 }
 0x103   :  { %v87_v28 = vpop.permute.xlu1 %86 }
 0x104   :  { %v130_v31 = vpop.permute.xlu0 %129  ;;  %v91_v35 = vsel %vm90_vm4, %v87_v28, %v89_v8  ;;  %v92_v43 = vsel %vm90_vm4, %v89_v8, %v87_v28 }
 0x105   :  { %v134_v37 = vsel %vm83_vm3, %v132_v24, %v130_v31  ;;  %v97_v41 = vsel %vm546_vm5, %v91_v35, %v85_v39  ;;  %v133_v46 = vsel %vm83_vm3, %v130_v31, %v132_v24  ;;  %v98_v51 = vsel %vm560_vm6, %v92_v43, %v84_v47  ;;  %v222_v1 = vpop.permute.xlu2 %221 }
 0x106   :  { %v141_v45 = vsel %vm546_vm5, %v139_v40, %v134_v37  ;;  %v99_v49 = vadd.f32 %v97_v41, %v445_v38  ;;  %v142_v56 = vsel %vm560_vm6, %v140_v50, %v133_v46  ;;  %v105_v57 = vsel %vm572_vm7, %v85_v39, %v91_v35 }
 0x107   :  { %v143_v52 = vadd.f32 %v141_v45, %v456_v44  ;;  %v100_v38 = vadd.f32 %v98_v51, %v425_v25  ;;  %v145_v60 = vsel %vm572_vm7, %v134_v37, %v139_v40  ;;  %v144_v44 = vadd.f32 %v142_v56, %v441_v36 }
 0x108   :  { %v591_v59 = vadd.f32 %v105_v57, %v99_v49  ;;  %v106_v62 = vsel %vm586_vm8, %v84_v47, %v92_v43  ;;  %v146_v25 = vsel %vm586_vm8, %v133_v46, %v140_v50 }
 0x109   :  { %v596_v61 = vadd.f32 %v145_v60, %v143_v52  ;;  %v600_v63 = vadd.f32 %v106_v62, %v100_v38  ;;  %v606_v3 = vadd.f32 %v146_v25, %v144_v44 }
 0x10a   :  { %v275_v0 = vmul.f32 %v591_v59, %v591_v59 }
 0x10b   :  { %v180_v32 = vpop.permute.xlu1 %179  ;;  %v277_v7 = vmul.f32 %v596_v61, %v596_v61  ;;  %v276_v33 = vmul.f32 %v600_v63, %v600_v63  ;;  %v278_v35 = vmul.f32 %v606_v3, %v606_v3  ;;  %v280_v34 = vmul.f32 %v606_v3, %v600_v63 }
 0x10d   :  { %v295_v43 = vadd.f32 %v277_v7, %v275_v0  ;;  %v296_v47 = vadd.f32 %v278_v35, %v276_v33  ;;  %v262_v60 = vpop.permute.xlu2 %261 }
 0x113   :  { %v172_v54 = vpop.permute.xlu1 %171  ;;  %v216_v55 = vpop.permute.xlu0 %215 }
 0x114   :  { %v175_v36 = vsel %vm83_vm3, %v172_v54, %v174_v29  ;;  %v176_v10 = vsel %vm83_vm3, %v174_v29, %v172_v54  ;;  %v217_v18 = vsel %vm83_vm3, %v214_v15, %v216_v55  ;;  %v218_v19 = vsel %vm83_vm3, %v216_v55, %v214_v15 }
 0x115   :  { %v297_v54 = vadd.f32 0.0081, %v295_v43  ;;  %v298_v55 = vadd.f32 0.0081, %v296_v47 }
 0x11b   :  { %v178_v11 = vpop.permute.xlu0 %177  ;;  %v220_v13 = vpop.permute.xlu1 %219 }
 0x11c   :  { %v181_v6 = vsel %vm90_vm4, %v178_v11, %v180_v32  ;;  %v182_v14 = vsel %vm90_vm4, %v180_v32, %v178_v11  ;;  %v223_v16 = vsel %vm90_vm4, %v220_v13, %v222_v1  ;;  %v224_v17 = vsel %vm90_vm4, %v222_v1, %v220_v13 }
 0x11d   :  { %v183_v20 = vsel %vm546_vm5, %v181_v6, %v176_v10  ;;  %v184_v8 = vsel %vm560_vm6, %v182_v14, %v175_v36  ;;  %v225_v24 = vsel %vm546_vm5, %v223_v16, %v218_v19  ;;  %v226_v26 = vsel %vm560_vm6, %v224_v17, %v217_v18 }
 0x11e   :  { %v185_v9 = vadd.f32 %v183_v20, %v497_v2  ;;  %v186_v23 = vadd.f32 %v184_v8, %v475_v53  ;;  %v187_v27 = vsel %vm572_vm7, %v176_v10, %v181_v6  ;;  %v188_v28 = vsel %vm586_vm8, %v175_v36, %v182_v14 }
 0x11f   :  { %v227_v29 = vadd.f32 %v225_v24, %v502_v5  ;;  %v228_v30 = vadd.f32 %v226_v26, %v500_v4  ;;  %v229_v53 = vsel %vm572_vm7, %v218_v19, %v223_v16  ;;  %v230_v32 = vsel %vm586_vm8, %v217_v18, %v224_v17 }
 0x120   :  { %v189_v31 = vadd.f32 %v187_v27, %v185_v9  ;;  %v190_v2 = vadd.f32 %v188_v28, %v186_v23  ;;  %v279_v14 = vmul.f32 %v596_v61, %v591_v59 }
 0x121   :  { %v231_v37 = vadd.f32 %v229_v53, %v227_v29  ;;  %v232_v39 = vadd.f32 %v230_v32, %v228_v30 }
 0x122   :  { %v299_v40 = vmul.f32 9.0, %v189_v31  ;;  %v300_v5 = vmul.f32 9.0, %v190_v2 }
 0x123   :  { %v303_v41 = vmul.f32 9.0, %v231_v37  ;;  %v304_v4 = vmul.f32 9.0, %v232_v39  ;;  %v256_v15 = vpop.permute.xlu0 %255  ;;  %v258_v38 = vpop.permute.xlu1 %257 }
 0x124   :  { %v301_v45 = vsub.f32 %v299_v40, %v275_v0  ;;  %v302_v46 = vsub.f32 %v300_v5, %v276_v33  ;;  %v259_v1 = vsel %vm83_vm3, %v256_v15, %v258_v38  ;;  %v260_v0 = vsel %vm83_vm3, %v258_v38, %v256_v15 }
 0x125   :  { %v305_v49 = vsub.f32 %v303_v41, %v277_v7  ;;  %v306_v50 = vsub.f32 %v304_v4, %v278_v35 }
 0x127   :  { %v307_v51 = vadd.f32 %v305_v49, %v301_v45  ;;  %v308_v52 = vadd.f32 %v306_v50, %v302_v46 }
 0x129   :  { %v309_v56 = vadd.f32 0.0729, %v307_v51  ;;  %v310_v57 = vadd.f32 0.0729, %v308_v52 }
 0x12b   :  { %v311_v44 = vmul.f32 %v309_v56, %v297_v54  ;;  %v312_v62 = vmul.f32 %v310_v57, %v298_v55  ;;  %v264_v25 = vpop.permute.xlu0 %263 }
 0x12c   :  { %v265_v7 = vsel %vm90_vm4, %v262_v60, %v264_v25  ;;  %v266_v36 = vsel %vm90_vm4, %v264_v25, %v262_v60 }
 0x12d   :  { %341 = vrcp.f32 %v311_v44  ;;  %v267_v10 = vsel %vm546_vm5, %v265_v7, %v260_v0  ;;  %v268_v11 = vsel %vm560_vm6, %v266_v36, %v259_v1  ;;  %v271_v16 = vsel %vm572_vm7, %v260_v0, %v265_v7 }
 0x12e   :  { %343 = vrcp.f32 %v312_v62  ;;  %v269_v13 = vadd.f32 %v267_v10, %v530_v21  ;;  %v270_v6 = vadd.f32 %v268_v11, %v532_v22  ;;  %v272_v12 = vsel %vm586_vm8, %v259_v1, %v266_v36 }
 0x12f   :  { %v281_v21 = vmul.f32 2.0, %v279_v14  ;;  %v282_v22 = vmul.f32 2.0, %v280_v34 }
 0x130   :  { %v273_v17 = vadd.f32 %v271_v16, %v269_v13  ;;  %v274_v42 = vadd.f32 %v272_v12, %v270_v6 }
 0x131   :  { %v283_v58 = vadd.f32 0.0081, %v281_v21  ;;  %v284_v28 = vadd.f32 0.0081, %v282_v22 }
 0x132   :  { %v285_v18 = vmul.f32 9.0, %v273_v17  ;;  %v286_v19 = vmul.f32 9.0, %v274_v42 }
 0x133   :  { %v342_v20 = vpop.eup %341 }
 0x134   :  { %v344_v8 = vpop.eup %343  ;;  %v315_v9 = vmul.f32 %v342_v20, %v311_v44  ;;  %v287_v23 = vsub.f32 %v285_v18, %v279_v14  ;;  %v288_v59 = vsub.f32 %v286_v19, %v280_v34 }
 0x135   :  { %v316_v61 = vmul.f32 %v344_v8, %v312_v62 }
 0x136   :  { %v317_v48 = vsub.f32 2.0, %v315_v9  ;;  %v289_v24 = vmul.f32 2.0, %v287_v23  ;;  %v290_v26 = vmul.f32 2.0, %v288_v59 }
 0x137   :  { %v318_v27 = vsub.f32 2.0, %v316_v61 }
 0x138   :  { %v291_v29 = vadd.f32 0.0729, %v289_v24  ;;  %v292_v63 = vadd.f32 0.0729, %v290_v26  ;;  %v319_v31 = vmul.f32 %v342_v20, %v317_v48 }
 0x139   :  { %v320_v2 = vmul.f32 %v344_v8, %v318_v27 }
 0x13a   :  { %v293_v3 = vmul.f32 %v291_v29, %v283_v58  ;;  %v294_v30 = vmul.f32 %v292_v63, %v284_v28 }
 0x13c   :  { %v321_v53 = vmul.f32 %v319_v31, %v293_v3  ;;  %v322_v32 = vmul.f32 %v320_v2, %v294_v30 }
 0x13e   :  { %v323_v33 = vsub.f32 1.0, %v321_v53  ;;  %v324_v35 = vsub.f32 1.0, %v322_v32 }
 0x140   :  { %v325_v37 = vmul.f32 0.5, %v323_v33  ;;  %v326_v39 = vmul.f32 0.5, %v324_v35 }
 0x142   :  { %v327_v40 = vmax.f32 %v325_v37, 0.0  ;;  %v328_v5 = vmax.f32 %v326_v39, 0.0 }
 0x144   :  { %v329_v41 = vmin.f32 %v327_v40, 1.0  ;;  %v330_v4 = vmin.f32 %v328_v5, 1.0 }
 0x146   :  { %331 = vst [vmem:[%s680_s2] sm:$0xff] %v329_v41 }
 0x147   :  { %332 = vst [vmem:[%s680_s2 + $0x8] sm:$0xff] %v330_v4 }

</bundles_post_ra>
